<compile_context>
chip_gen: v6e
topology: v6e:2x2x1
jax: 0.10.0
libtpu: 0.0.40
codegen_flags: <defaults>
</compile_context>

<pallas_src>
import functools

import jax
import jax.numpy as jnp
import jax.scipy.linalg as jsl
from jax.experimental import pallas as pl
from jax.experimental.pallas import tpu as pltpu

NEG_SLOPE = 0.2   # HANConv default negative_slope
NEG_INF = -1e30


def _full_spec(shape):
    # whole-array block (block_shape == array shape), no grid.
    return pl.BlockSpec(shape, lambda *_: (0,) * len(shape))


# --------------------------- fused Pallas kernel ---------------------------

def _bnnhan_fused_kernel(*refs, edge_meta, dst_row, n_dst, heads, head_dim, dim_h):
    # ref order: x_bd, w_bd, b_cat, att_w, adj_0..adj_{E-1}, head_mask,
    #            k_w, k_b, q, lin_w, lin_b, out
    n_edges = len(edge_meta)
    x_ref, w_ref, b_ref, attw_ref = refs[0:4]
    adj_refs = refs[4:4 + n_edges]
    hmask_ref, kw_ref, kb_ref, q_ref, linw_ref, linb_ref, out_ref = refs[4 + n_edges:]

    # ---- 1) all node-type projections: ONE block-diagonal bf16 MXU push ----
    h_all = jnp.dot(x_ref[...], w_ref[...],
                    preferred_element_type=jnp.float32) + b_ref[...]      # (Nt, T*dim_h) f32

    # ---- 2) node-level attention logits for ALL edge types / heads: ONE push ----
    logits = jnp.dot(h_all.astype(jnp.bfloat16), attw_ref[...],
                     preferred_element_type=jnp.float32)                  # (Nt, E*2H) f32

    hmask = hmask_ref[...]                                                # (H, H*D) f32, 0/1

    edge_outs = []
    for e, (src_row, n_src, src_col) in enumerate(edge_meta):
        xs = h_all[src_row:src_row + n_src, src_col:src_col + dim_h]      # (Ns, H*D) f32
        a_src_t = logits[src_row:src_row + n_src,
                         e * 2 * heads:e * 2 * heads + heads].T           # (H, Ns)
        a_dst = logits[dst_row:dst_row + n_dst,
                       e * 2 * heads + heads:e * 2 * heads + 2 * heads]   # (Nd, H)

        adj = adj_refs[e][...]                                            # (Nd, Ns) 0/1 f32
        neg_bias = (adj - 1.0) * (-NEG_INF)                               # 0 / -1e30, f32, once per edge type
        has_edge = jnp.max(adj, axis=1, keepdims=True) > 0.5              # (Nd, 1)

        out_e = None
        for hh in range(heads):                       # static small H; values stay in vregs
            s = a_dst[:, hh:hh + 1] + a_src_t[hh:hh + 1, :]               # (Nd, Ns) f32
            s = jnp.maximum(s, NEG_SLOPE * s)                             # leaky_relu (0 < slope < 1)
            s = s + neg_bias                                              # additive edge mask
            m = jnp.max(s, axis=1, keepdims=True)
            p = jnp.exp(s - m)                                            # masked lanes underflow to 0
            denom = jnp.sum(p, axis=1, keepdims=True)                     # >= 1 for rows with an edge
            attn = p * pl.reciprocal(denom, approx=True)                  # EUP reciprocal
            # TODO(synk): attention dropout (p=0.6) is identity in eval mode; omitted.
            xs_h = (xs * hmask[hh:hh + 1, :]).astype(jnp.bfloat16)        # head lanes only, lane-dense RHS
            contrib = jnp.dot(attn.astype(jnp.bfloat16), xs_h,
                              preferred_element_type=jnp.float32)         # (Nd, H*D) f32
            out_e = contrib if out_e is None else out_e + contrib
        out_e = jnp.where(has_edge, jnp.maximum(out_e, 0.0), 0.0)         # relu; isolated dst -> 0
        edge_outs.append(out_e)

    # ---- 3) semantic (metapath-level) attention over edge types ----
    kw = kw_ref[...]
    kb = kb_ref[...]
    q = q_ref[...]
    sem_scores = []
    for out_e in edge_outs:
        k = jnp.tanh(jnp.dot(out_e.astype(jnp.bfloat16), kw,
                             preferred_element_type=jnp.float32) + kb)
        k_mean = jnp.mean(k, axis=0, keepdims=True)                       # (1, F)
        sem_scores.append(jnp.sum(q * k_mean, axis=1, keepdims=True))     # (1, 1)
    m_sem = sem_scores[0]
    for sc in sem_scores[1:]:
        m_sem = jnp.maximum(m_sem, sc)
    exps = [jnp.exp(sc - m_sem) for sc in sem_scores]
    denom = exps[0]
    for ex in exps[1:]:
        denom = denom + ex
    inv = 1.0 / denom                                                     # (1,1); exact, tiny
    fused = edge_outs[0] * (exps[0] * inv)
    for out_e, ex in zip(edge_outs[1:], exps[1:]):
        fused = fused + out_e * (ex * inv)

    # ---- 4) final Linear(dim_h, dim_out) ----
    y = jnp.dot(fused.astype(jnp.bfloat16), linw_ref[...],
                preferred_element_type=jnp.float32) + linb_ref[...]
    out_ref[...] = y.astype(out_ref.dtype)


# --------------------------- wrapper (one pallas_call) ---------------------------

def _block_diag_cols(att):
    # att: (H, D) -> (H*D, H) with column h holding att[h] in rows h*D:(h+1)*D.
    heads, head_dim = att.shape
    eye = jnp.eye(heads, dtype=jnp.float32)
    return (att.astype(jnp.float32)[:, :, None] * eye[:, None, :]).reshape(heads * head_dim, heads)


def bnnhan_forward(params, x_dict, adj_dict, *, heads, head_dim, dst_type="SUBJECT"):
    node_types = list(x_dict.keys())
    dim_h = heads * head_dim
    # skip edge types whose dst is never consumed (only 'SUBJECT' feeds the head).
    edge_list = [(et, adj) for et, adj in adj_dict.items() if et[2] == dst_type]
    n_edges = len(edge_list)

    f32, bf16 = jnp.float32, jnp.bfloat16

    counts = {nt: x_dict[nt].shape[0] for nt in node_types}
    dims_in = {nt: x_dict[nt].shape[1] for nt in node_types}
    row_off, col_h_off = {}, {}
    r = ch = 0
    for nt in node_types:
        row_off[nt], col_h_off[nt] = r, ch
        r += counts[nt]
        ch += dim_h
    total_h_cols = ch

    # fused block-diagonal projection operands (one MXU push for all node types).
    x_bd = jsl.block_diag(*[jnp.asarray(x_dict[nt], f32) for nt in node_types]).astype(bf16)
    w_bd = jsl.block_diag(*[jnp.asarray(params["proj"][nt]["w"], f32)
                            for nt in node_types]).astype(bf16)
    b_cat = jnp.concatenate([jnp.asarray(params["proj"][nt]["b"], f32)
                             for nt in node_types]).reshape(1, -1)

    # fused attention-logit weight: (T*dim_h, E*2H); per edge type, att_src at the
    # src type's feature rows (cols e*2H:e*2H+H), att_dst at the dst type's rows.
    att_w = jnp.zeros((total_h_cols, n_edges * 2 * heads), f32)
    edge_meta = []
    for e, (et, _) in enumerate(edge_list):
        key = "__".join(et)
        src_nt = et[0]
        att_w = att_w.at[col_h_off[src_nt]:col_h_off[src_nt] + dim_h,
                         e * 2 * heads:e * 2 * heads + heads].set(
            _block_diag_cols(params["att_src"][key]))
        att_w = att_w.at[col_h_off[dst_type]:col_h_off[dst_type] + dim_h,
                         e * 2 * heads + heads:e * 2 * heads + 2 * heads].set(
            _block_diag_cols(params["att_dst"][key]))
        edge_meta.append((row_off[src_nt], counts[src_nt], col_h_off[src_nt]))
    att_w = att_w.astype(bf16)

    # per-head lane mask: row h is 1 on lanes [h*D, (h+1)*D).
    head_mask = jnp.repeat(jnp.eye(heads, dtype=f32), head_dim, axis=1)   # (H, H*D)

    inputs = [x_bd, w_bd, b_cat, att_w]
    inputs += [jnp.asarray(adj, f32) for _, adj in edge_list]
    inputs += [head_mask,
               jnp.asarray(params["k_lin_w"], f32).astype(bf16),
               jnp.asarray(params["k_lin_b"], f32).reshape(1, -1),
               jnp.asarray(params["q"], f32).reshape(1, -1),
               jnp.asarray(params["lin_w"], f32).astype(bf16),
               jnp.asarray(params["lin_b"], f32).reshape(1, -1)]
    in_specs = [_full_spec(a.shape) for a in inputs]

    n_dst = counts[dst_type]
    dim_out = params["lin_w"].shape[1]

    kernel = functools.partial(
        _bnnhan_fused_kernel,
        edge_meta=tuple(edge_meta),
        dst_row=row_off[dst_type],
        n_dst=n_dst,
        heads=heads,
        head_dim=head_dim,
        dim_h=dim_h,
    )
    # TODO(synk): for non-toy graphs add a grid over dst-row tiles ("parallel",
    # uses the 2nd v7x TensorCore) x src-col tiles ("arbitrary", online softmax).
    return pl.pallas_call(
        kernel,
        out_shape=jax.ShapeDtypeStruct((n_dst, dim_out), jnp.float32),
        in_specs=in_specs,
        out_specs=_full_spec((n_dst, dim_out)),
        compiler_params=pltpu.CompilerParams(vmem_limit_bytes=32 * 1024 * 1024),
    )(*inputs)


# --------------------------- plain-JAX reference (for correctness) ---------------------------

def bnnhan_reference(params, x_dict, adj_dict, *, heads, head_dim):
    h_dict = {nt: x @ params["proj"][nt]["w"] + params["proj"][nt]["b"]
              for nt, x in x_dict.items()}
    outs = []
    for edge_type, adj in adj_dict.items():
        src, _, dst = edge_type
        key = "__".join(edge_type)
        xs = h_dict[src].reshape(-1, heads, head_dim)
        xd = h_dict[dst].reshape(-1, heads, head_dim)
        a_s = jnp.sum(xs * params["att_src"][key][None], axis=-1)     # (Ns, H)
        a_d = jnp.sum(xd * params["att_dst"][key][None], axis=-1)     # (Nd, H)
        scores = a_d[:, None, :] + a_s[None, :, :]                    # (Nd, Ns, H)
        scores = jnp.where(scores > 0, scores, NEG_SLOPE * scores)
        mask = adj[:, :, None] > 0.5
        scores = jnp.where(mask, scores, NEG_INF)
        p = jnp.exp(scores - jnp.max(scores, axis=1, keepdims=True))
        p = jnp.where(mask, p, 0.0)
        attn = p / (jnp.sum(p, axis=1, keepdims=True) + 1e-16)
        out = jnp.einsum("dsh,shk->dhk", attn, xs)
        out = jnp.where(jnp.sum(adj, axis=1)[:, None, None] > 0.5, out, 0.0)
        out = jax.nn.relu(out).reshape(out.shape[0], -1)
        if dst == "SUBJECT":
            outs.append(out)
    stacked = jnp.stack(outs)
    k = jnp.tanh(stacked @ params["k_lin_w"] + params["k_lin_b"])
    score = jnp.sum(params["q"][0] * jnp.mean(k, axis=1), axis=-1)
    sem = jax.nn.softmax(score, axis=0)
    fused = jnp.sum(sem[:, None, None] * stacked, axis=0)
    return fused @ params["lin_w"] + params["lin_b"]


# --------------------------- deterministic parameter init ---------------------------

def init_params(key, dim_in, dim_h, dim_out, heads, node_types, edge_types):
    head_dim = dim_h // heads
    n_keys = 2 * len(node_types) + 2 * len(edge_types) + 6
    keys = iter(jax.random.split(key, n_keys))

    def nrm(shape, scale):
        return scale * jax.random.normal(next(keys), shape, jnp.float32)

    params = {"proj": {}, "att_src": {}, "att_dst": {}}
    for nt in node_types:
        params["proj"][nt] = {"w": nrm((dim_in, dim_h), dim_in ** -0.5),
                              "b": nrm((dim_h,), 0.02)}
    for et in edge_types:
        k = "__".join(et)
        params["att_src"][k] = nrm((heads, head_dim), head_dim ** -0.5)
        params["att_dst"][k] = nrm((heads, head_dim), head_dim ** -0.5)
    params["k_lin_w"] = nrm((dim_h, dim_h), dim_h ** -0.5)
    params["k_lin_b"] = nrm((dim_h,), 0.02)
    params["q"] = nrm((1, dim_h), dim_h ** -0.5)
    params["lin_w"] = nrm((dim_h, dim_out), dim_h ** -0.5)
    params["lin_b"] = nrm((dim_out,), 0.02)
    return params


# --------------------------- main ---------------------------

if __name__ == "__main__":
    DIM_IN, DIM_H, DIM_OUT, HEADS = 16, 32, 4, 4
    HEAD_DIM = DIM_H // HEADS
    N_SUB, N_ELE = 8, 16

    node_types = ["SUBJECT", "ELECTRODE"]
    edge_types = [("ELECTRODE", "measures", "SUBJECT"),
                  ("SUBJECT", "self", "SUBJECT")]

    key = jax.random.PRNGKey(0)
    k_xs, k_xe, k_adj, k_par = jax.random.split(key, 4)

    x_dict = {"SUBJECT": jax.random.normal(k_xs, (N_SUB, DIM_IN), jnp.float32),
              "ELECTRODE": jax.random.normal(k_xe, (N_ELE, DIM_IN), jnp.float32)}

    adj_es = (jax.random.uniform(k_adj, (N_SUB, N_ELE)) < 0.4).astype(jnp.float32)
    adj_es = adj_es.at[:, 0].set(1.0)            # every SUBJECT has >= 1 incoming edge
    adj_ss = jnp.eye(N_SUB, dtype=jnp.float32)   # self-loop metapath
    adj_dict = {edge_types[0]: adj_es, edge_types[1]: adj_ss}

    params = init_params(k_par, DIM_IN, DIM_H, DIM_OUT, HEADS, node_types, edge_types)

    out = bnnhan_forward(params, x_dict, adj_dict, heads=HEADS, head_dim=HEAD_DIM)
    out = jax.block_until_ready(out)

    ref = bnnhan_reference(params, x_dict, adj_dict, heads=HEADS, head_dim=HEAD_DIM)
    assert out.shape == (N_SUB, DIM_OUT)
    # tolerance accounts for bf16 MXU operands + pl.reciprocal(approx=True);
    # all elementwise / softmax math is f32, so errors stay at the ~1% level.
    assert jnp.allclose(out, ref, atol=5e-2, rtol=5e-2), (out, ref)

    print("KERNEL_OK")
</pallas_src>

<mosaic_0001>
module attributes {stable_mosaic.version = 11 : i64} {
  func.func @_bnnhan_fused_kernel(%arg0: memref<24x32xbf16, #tpu.memory_space<vmem>>, %arg1: memref<32x64xbf16, #tpu.memory_space<vmem>>, %arg2: memref<1x64xf32, #tpu.memory_space<vmem>>, %arg3: memref<64x16xbf16, #tpu.memory_space<vmem>>, %arg4: memref<8x16xf32, #tpu.memory_space<vmem>>, %arg5: memref<8x8xf32, #tpu.memory_space<vmem>>, %arg6: memref<4x32xf32, #tpu.memory_space<vmem>>, %arg7: memref<32x32xbf16, #tpu.memory_space<vmem>>, %arg8: memref<1x32xf32, #tpu.memory_space<vmem>>, %arg9: memref<1x32xf32, #tpu.memory_space<vmem>>, %arg10: memref<32x4xbf16, #tpu.memory_space<vmem>>, %arg11: memref<1x4xf32, #tpu.memory_space<vmem>>, %arg12: memref<8x4xf32, #tpu.memory_space<vmem>>) attributes {dimension_semantics = [], scalar_prefetch = 0 : i64, scratch_operands = 0 : i64, tpu.core_type = #tpu.core_type<tc>} {
    %c0 = arith.constant 0 : index
    %c0_0 = arith.constant 0 : index
    %0 = vector.load %arg0[%c0, %c0_0] : memref<24x32xbf16, #tpu.memory_space<vmem>>, vector<24x32xbf16>
    %c0_1 = arith.constant 0 : index
    %c0_2 = arith.constant 0 : index
    %1 = vector.load %arg1[%c0_1, %c0_2] : memref<32x64xbf16, #tpu.memory_space<vmem>>, vector<32x64xbf16>
    %cst = arith.constant dense<0.000000e+00> : vector<24x64xf32>
    %2 = tpu.matmul %0, %1, %cst {dimension_numbers = #tpu.dot_dimension_numbers<[1], [0], [0], [1], [0, 0, 1, 1], [], []>} : vector<24x32xbf16>, vector<32x64xbf16>, vector<24x64xf32> -> vector<24x64xf32>
    %c0_3 = arith.constant 0 : index
    %c0_4 = arith.constant 0 : index
    %3 = vector.load %arg2[%c0_3, %c0_4] : memref<1x64xf32, #tpu.memory_space<vmem>>, vector<1x64xf32>
    %4 = vector.broadcast %3 : vector<1x64xf32> to vector<24x64xf32>
    %5 = arith.addf %2, %4 : vector<24x64xf32>
    %6 = arith.truncf %5 : vector<24x64xf32> to vector<24x64xbf16>
    %c0_5 = arith.constant 0 : index
    %c0_6 = arith.constant 0 : index
    %7 = vector.load %arg3[%c0_5, %c0_6] : memref<64x16xbf16, #tpu.memory_space<vmem>>, vector<64x16xbf16>
    %cst_7 = arith.constant dense<0.000000e+00> : vector<24x16xf32>
    %8 = tpu.matmul %6, %7, %cst_7 {dimension_numbers = #tpu.dot_dimension_numbers<[1], [0], [0], [1], [0, 0, 1, 1], [], []>} : vector<24x64xbf16>, vector<64x16xbf16>, vector<24x16xf32> -> vector<24x16xf32>
    %c0_8 = arith.constant 0 : index
    %c0_9 = arith.constant 0 : index
    %9 = vector.load %arg6[%c0_8, %c0_9] : memref<4x32xf32, #tpu.memory_space<vmem>>, vector<4x32xf32>
    %10 = vector.extract_strided_slice %5 {offsets = [8, 32], sizes = [16, 32], strides = [1, 1]} : vector<24x64xf32> to vector<16x32xf32>
    %11 = vector.extract_strided_slice %8 {offsets = [8, 0], sizes = [16, 4], strides = [1, 1]} : vector<24x16xf32> to vector<16x4xf32>
    %12 = tpu.transpose %11, [1, 0] : vector<16x4xf32> -> vector<4x16xf32>
    %13 = vector.extract_strided_slice %8 {offsets = [0, 4], sizes = [8, 4], strides = [1, 1]} : vector<24x16xf32> to vector<8x4xf32>
    %c0_10 = arith.constant 0 : index
    %c0_11 = arith.constant 0 : index
    %14 = vector.load %arg4[%c0_10, %c0_11] : memref<8x16xf32, #tpu.memory_space<vmem>>, vector<8x16xf32>
    %cst_12 = arith.constant 1.000000e+00 : f32
    %15 = vector.broadcast %cst_12 : f32 to vector<8x16xf32>
    %16 = arith.subf %14, %15 : vector<8x16xf32>
    %cst_13 = arith.constant 1.000000e+30 : f32
    %17 = vector.broadcast %cst_13 : f32 to vector<8x16xf32>
    %18 = arith.mulf %16, %17 : vector<8x16xf32>
    %cst_14 = arith.constant dense<0xFF800000> : vector<8xf32>
    %19 = vector.multi_reduction <maximumf>, %14, %cst_14 [1] : vector<8x16xf32> to vector<8xf32>
    %20 = vector.shape_cast %19 : vector<8xf32> to vector<8x1xf32>
    %cst_15 = arith.constant 5.000000e-01 : f32
    %21 = vector.broadcast %cst_15 : f32 to vector<8x1xf32>
    %22 = arith.cmpf ogt, %20, %21 : vector<8x1xf32>
    %23 = vector.extract_strided_slice %13 {offsets = [0, 0], sizes = [8, 1], strides = [1, 1]} : vector<8x4xf32> to vector<8x1xf32>
    %24 = vector.extract_strided_slice %12 {offsets = [0, 0], sizes = [1, 16], strides = [1, 1]} : vector<4x16xf32> to vector<1x16xf32>
    %25 = vector.broadcast %23 : vector<8x1xf32> to vector<8x16xf32>
    %26 = vector.broadcast %24 : vector<1x16xf32> to vector<8x16xf32>
    %27 = arith.addf %25, %26 : vector<8x16xf32>
    %cst_16 = arith.constant 2.000000e-01 : f32
    %28 = vector.broadcast %cst_16 : f32 to vector<8x16xf32>
    %29 = arith.mulf %28, %27 : vector<8x16xf32>
    %30 = arith.maximumf %27, %29 : vector<8x16xf32>
    %31 = arith.addf %30, %18 : vector<8x16xf32>
    %cst_17 = arith.constant dense<0xFF800000> : vector<8xf32>
    %32 = vector.multi_reduction <maximumf>, %31, %cst_17 [1] : vector<8x16xf32> to vector<8xf32>
    %33 = vector.shape_cast %32 : vector<8xf32> to vector<8x1xf32>
    %34 = vector.broadcast %33 : vector<8x1xf32> to vector<8x16xf32>
    %35 = arith.subf %31, %34 : vector<8x16xf32>
    %36 = math.exp %35 : vector<8x16xf32>
    %cst_18 = arith.constant dense<0.000000e+00> : vector<8xf32>
    %37 = vector.multi_reduction <add>, %36, %cst_18 [1] : vector<8x16xf32> to vector<8xf32>
    %38 = vector.shape_cast %37 : vector<8xf32> to vector<8x1xf32>
    %39 = tpu.reciprocal %38 {approx = true} : vector<8x1xf32> -> vector<8x1xf32>
    %40 = vector.broadcast %39 : vector<8x1xf32> to vector<8x16xf32>
    %41 = arith.mulf %36, %40 : vector<8x16xf32>
    %42 = vector.extract_strided_slice %9 {offsets = [0, 0], sizes = [1, 32], strides = [1, 1]} : vector<4x32xf32> to vector<1x32xf32>
    %43 = vector.broadcast %42 : vector<1x32xf32> to vector<16x32xf32>
    %44 = arith.mulf %10, %43 : vector<16x32xf32>
    %45 = arith.truncf %44 : vector<16x32xf32> to vector<16x32xbf16>
    %46 = arith.truncf %41 : vector<8x16xf32> to vector<8x16xbf16>
    %cst_19 = arith.constant dense<0.000000e+00> : vector<8x32xf32>
    %47 = tpu.matmul %46, %45, %cst_19 {dimension_numbers = #tpu.dot_dimension_numbers<[1], [0], [0], [1], [0, 0, 1, 1], [], []>} : vector<8x16xbf16>, vector<16x32xbf16>, vector<8x32xf32> -> vector<8x32xf32>
    %48 = vector.extract_strided_slice %13 {offsets = [0, 1], sizes = [8, 1], strides = [1, 1]} : vector<8x4xf32> to vector<8x1xf32>
    %49 = vector.extract_strided_slice %12 {offsets = [1, 0], sizes = [1, 16], strides = [1, 1]} : vector<4x16xf32> to vector<1x16xf32>
    %50 = vector.broadcast %48 : vector<8x1xf32> to vector<8x16xf32>
    %51 = vector.broadcast %49 : vector<1x16xf32> to vector<8x16xf32>
    %52 = arith.addf %50, %51 : vector<8x16xf32>
    %cst_20 = arith.constant 2.000000e-01 : f32
    %53 = vector.broadcast %cst_20 : f32 to vector<8x16xf32>
    %54 = arith.mulf %53, %52 : vector<8x16xf32>
    %55 = arith.maximumf %52, %54 : vector<8x16xf32>
    %56 = arith.addf %55, %18 : vector<8x16xf32>
    %cst_21 = arith.constant dense<0xFF800000> : vector<8xf32>
    %57 = vector.multi_reduction <maximumf>, %56, %cst_21 [1] : vector<8x16xf32> to vector<8xf32>
    %58 = vector.shape_cast %57 : vector<8xf32> to vector<8x1xf32>
    %59 = vector.broadcast %58 : vector<8x1xf32> to vector<8x16xf32>
    %60 = arith.subf %56, %59 : vector<8x16xf32>
    %61 = math.exp %60 : vector<8x16xf32>
    %cst_22 = arith.constant dense<0.000000e+00> : vector<8xf32>
    %62 = vector.multi_reduction <add>, %61, %cst_22 [1] : vector<8x16xf32> to vector<8xf32>
    %63 = vector.shape_cast %62 : vector<8xf32> to vector<8x1xf32>
    %64 = tpu.reciprocal %63 {approx = true} : vector<8x1xf32> -> vector<8x1xf32>
    %65 = vector.broadcast %64 : vector<8x1xf32> to vector<8x16xf32>
    %66 = arith.mulf %61, %65 : vector<8x16xf32>
    %67 = vector.extract_strided_slice %9 {offsets = [1, 0], sizes = [1, 32], strides = [1, 1]} : vector<4x32xf32> to vector<1x32xf32>
    %68 = vector.broadcast %67 : vector<1x32xf32> to vector<16x32xf32>
    %69 = arith.mulf %10, %68 : vector<16x32xf32>
    %70 = arith.truncf %69 : vector<16x32xf32> to vector<16x32xbf16>
    %71 = arith.truncf %66 : vector<8x16xf32> to vector<8x16xbf16>
    %cst_23 = arith.constant dense<0.000000e+00> : vector<8x32xf32>
    %72 = tpu.matmul %71, %70, %cst_23 {dimension_numbers = #tpu.dot_dimension_numbers<[1], [0], [0], [1], [0, 0, 1, 1], [], []>} : vector<8x16xbf16>, vector<16x32xbf16>, vector<8x32xf32> -> vector<8x32xf32>
    %73 = arith.addf %47, %72 : vector<8x32xf32>
    %74 = vector.extract_strided_slice %13 {offsets = [0, 2], sizes = [8, 1], strides = [1, 1]} : vector<8x4xf32> to vector<8x1xf32>
    %75 = vector.extract_strided_slice %12 {offsets = [2, 0], sizes = [1, 16], strides = [1, 1]} : vector<4x16xf32> to vector<1x16xf32>
    %76 = vector.broadcast %74 : vector<8x1xf32> to vector<8x16xf32>
    %77 = vector.broadcast %75 : vector<1x16xf32> to vector<8x16xf32>
    %78 = arith.addf %76, %77 : vector<8x16xf32>
    %cst_24 = arith.constant 2.000000e-01 : f32
    %79 = vector.broadcast %cst_24 : f32 to vector<8x16xf32>
    %80 = arith.mulf %79, %78 : vector<8x16xf32>
    %81 = arith.maximumf %78, %80 : vector<8x16xf32>
    %82 = arith.addf %81, %18 : vector<8x16xf32>
    %cst_25 = arith.constant dense<0xFF800000> : vector<8xf32>
    %83 = vector.multi_reduction <maximumf>, %82, %cst_25 [1] : vector<8x16xf32> to vector<8xf32>
    %84 = vector.shape_cast %83 : vector<8xf32> to vector<8x1xf32>
    %85 = vector.broadcast %84 : vector<8x1xf32> to vector<8x16xf32>
    %86 = arith.subf %82, %85 : vector<8x16xf32>
    %87 = math.exp %86 : vector<8x16xf32>
    %cst_26 = arith.constant dense<0.000000e+00> : vector<8xf32>
    %88 = vector.multi_reduction <add>, %87, %cst_26 [1] : vector<8x16xf32> to vector<8xf32>
    %89 = vector.shape_cast %88 : vector<8xf32> to vector<8x1xf32>
    %90 = tpu.reciprocal %89 {approx = true} : vector<8x1xf32> -> vector<8x1xf32>
    %91 = vector.broadcast %90 : vector<8x1xf32> to vector<8x16xf32>
    %92 = arith.mulf %87, %91 : vector<8x16xf32>
    %93 = vector.extract_strided_slice %9 {offsets = [2, 0], sizes = [1, 32], strides = [1, 1]} : vector<4x32xf32> to vector<1x32xf32>
    %94 = vector.broadcast %93 : vector<1x32xf32> to vector<16x32xf32>
    %95 = arith.mulf %10, %94 : vector<16x32xf32>
    %96 = arith.truncf %95 : vector<16x32xf32> to vector<16x32xbf16>
    %97 = arith.truncf %92 : vector<8x16xf32> to vector<8x16xbf16>
    %cst_27 = arith.constant dense<0.000000e+00> : vector<8x32xf32>
    %98 = tpu.matmul %97, %96, %cst_27 {dimension_numbers = #tpu.dot_dimension_numbers<[1], [0], [0], [1], [0, 0, 1, 1], [], []>} : vector<8x16xbf16>, vector<16x32xbf16>, vector<8x32xf32> -> vector<8x32xf32>
    %99 = arith.addf %73, %98 : vector<8x32xf32>
    %100 = vector.extract_strided_slice %13 {offsets = [0, 3], sizes = [8, 1], strides = [1, 1]} : vector<8x4xf32> to vector<8x1xf32>
    %101 = vector.extract_strided_slice %12 {offsets = [3, 0], sizes = [1, 16], strides = [1, 1]} : vector<4x16xf32> to vector<1x16xf32>
    %102 = vector.broadcast %100 : vector<8x1xf32> to vector<8x16xf32>
    %103 = vector.broadcast %101 : vector<1x16xf32> to vector<8x16xf32>
    %104 = arith.addf %102, %103 : vector<8x16xf32>
    %cst_28 = arith.constant 2.000000e-01 : f32
    %105 = vector.broadcast %cst_28 : f32 to vector<8x16xf32>
    %106 = arith.mulf %105, %104 : vector<8x16xf32>
    %107 = arith.maximumf %104, %106 : vector<8x16xf32>
    %108 = arith.addf %107, %18 : vector<8x16xf32>
    %cst_29 = arith.constant dense<0xFF800000> : vector<8xf32>
    %109 = vector.multi_reduction <maximumf>, %108, %cst_29 [1] : vector<8x16xf32> to vector<8xf32>
    %110 = vector.shape_cast %109 : vector<8xf32> to vector<8x1xf32>
    %111 = vector.broadcast %110 : vector<8x1xf32> to vector<8x16xf32>
    %112 = arith.subf %108, %111 : vector<8x16xf32>
    %113 = math.exp %112 : vector<8x16xf32>
    %cst_30 = arith.constant dense<0.000000e+00> : vector<8xf32>
    %114 = vector.multi_reduction <add>, %113, %cst_30 [1] : vector<8x16xf32> to vector<8xf32>
    %115 = vector.shape_cast %114 : vector<8xf32> to vector<8x1xf32>
    %116 = tpu.reciprocal %115 {approx = true} : vector<8x1xf32> -> vector<8x1xf32>
    %117 = vector.broadcast %116 : vector<8x1xf32> to vector<8x16xf32>
    %118 = arith.mulf %113, %117 : vector<8x16xf32>
    %119 = vector.extract_strided_slice %9 {offsets = [3, 0], sizes = [1, 32], strides = [1, 1]} : vector<4x32xf32> to vector<1x32xf32>
    %120 = vector.broadcast %119 : vector<1x32xf32> to vector<16x32xf32>
    %121 = arith.mulf %10, %120 : vector<16x32xf32>
    %122 = arith.truncf %121 : vector<16x32xf32> to vector<16x32xbf16>
    %123 = arith.truncf %118 : vector<8x16xf32> to vector<8x16xbf16>
    %cst_31 = arith.constant dense<0.000000e+00> : vector<8x32xf32>
    %124 = tpu.matmul %123, %122, %cst_31 {dimension_numbers = #tpu.dot_dimension_numbers<[1], [0], [0], [1], [0, 0, 1, 1], [], []>} : vector<8x16xbf16>, vector<16x32xbf16>, vector<8x32xf32> -> vector<8x32xf32>
    %125 = arith.addf %99, %124 : vector<8x32xf32>
    %cst_32 = arith.constant 0.000000e+00 : f32
    %126 = vector.broadcast %cst_32 : f32 to vector<8x32xf32>
    %127 = arith.maximumf %125, %126 : vector<8x32xf32>
    %cst_33 = arith.constant 0.000000e+00 : f32
    %128 = vector.shape_cast %22 : vector<8x1xi1> to vector<8x1xi1>
    %129 = vector.broadcast %128 : vector<8x1xi1> to vector<8x32xi1>
    %130 = vector.broadcast %cst_33 : f32 to vector<8x32xf32>
    %131 = arith.select %129, %127, %130 : vector<8x32xi1>, vector<8x32xf32>
    %132 = vector.extract_strided_slice %5 {offsets = [0, 0], sizes = [8, 32], strides = [1, 1]} : vector<24x64xf32> to vector<8x32xf32>
    %133 = vector.extract_strided_slice %8 {offsets = [0, 8], sizes = [8, 4], strides = [1, 1]} : vector<24x16xf32> to vector<8x4xf32>
    %134 = tpu.transpose %133, [1, 0] : vector<8x4xf32> -> vector<4x8xf32>
    %135 = vector.extract_strided_slice %8 {offsets = [0, 12], sizes = [8, 4], strides = [1, 1]} : vector<24x16xf32> to vector<8x4xf32>
    %c0_34 = arith.constant 0 : index
    %c0_35 = arith.constant 0 : index
    %136 = vector.load %arg5[%c0_34, %c0_35] : memref<8x8xf32, #tpu.memory_space<vmem>>, vector<8x8xf32>
    %cst_36 = arith.constant 1.000000e+00 : f32
    %137 = vector.broadcast %cst_36 : f32 to vector<8x8xf32>
    %138 = arith.subf %136, %137 : vector<8x8xf32>
    %cst_37 = arith.constant 1.000000e+30 : f32
    %139 = vector.broadcast %cst_37 : f32 to vector<8x8xf32>
    %140 = arith.mulf %138, %139 : vector<8x8xf32>
    %cst_38 = arith.constant dense<0xFF800000> : vector<8xf32>
    %141 = vector.multi_reduction <maximumf>, %136, %cst_38 [1] : vector<8x8xf32> to vector<8xf32>
    %142 = vector.shape_cast %141 : vector<8xf32> to vector<8x1xf32>
    %cst_39 = arith.constant 5.000000e-01 : f32
    %143 = vector.broadcast %cst_39 : f32 to vector<8x1xf32>
    %144 = arith.cmpf ogt, %142, %143 : vector<8x1xf32>
    %145 = vector.extract_strided_slice %135 {offsets = [0, 0], sizes = [8, 1], strides = [1, 1]} : vector<8x4xf32> to vector<8x1xf32>
    %146 = vector.extract_strided_slice %134 {offsets = [0, 0], sizes = [1, 8], strides = [1, 1]} : vector<4x8xf32> to vector<1x8xf32>
    %147 = vector.broadcast %145 : vector<8x1xf32> to vector<8x8xf32>
    %148 = vector.broadcast %146 : vector<1x8xf32> to vector<8x8xf32>
    %149 = arith.addf %147, %148 : vector<8x8xf32>
    %cst_40 = arith.constant 2.000000e-01 : f32
    %150 = vector.broadcast %cst_40 : f32 to vector<8x8xf32>
    %151 = arith.mulf %150, %149 : vector<8x8xf32>
    %152 = arith.maximumf %149, %151 : vector<8x8xf32>
    %153 = arith.addf %152, %140 : vector<8x8xf32>
    %cst_41 = arith.constant dense<0xFF800000> : vector<8xf32>
    %154 = vector.multi_reduction <maximumf>, %153, %cst_41 [1] : vector<8x8xf32> to vector<8xf32>
    %155 = vector.shape_cast %154 : vector<8xf32> to vector<8x1xf32>
    %156 = vector.broadcast %155 : vector<8x1xf32> to vector<8x8xf32>
    %157 = arith.subf %153, %156 : vector<8x8xf32>
    %158 = math.exp %157 : vector<8x8xf32>
    %cst_42 = arith.constant dense<0.000000e+00> : vector<8xf32>
    %159 = vector.multi_reduction <add>, %158, %cst_42 [1] : vector<8x8xf32> to vector<8xf32>
    %160 = vector.shape_cast %159 : vector<8xf32> to vector<8x1xf32>
    %161 = tpu.reciprocal %160 {approx = true} : vector<8x1xf32> -> vector<8x1xf32>
    %162 = vector.broadcast %161 : vector<8x1xf32> to vector<8x8xf32>
    %163 = arith.mulf %158, %162 : vector<8x8xf32>
    %164 = vector.extract_strided_slice %9 {offsets = [0, 0], sizes = [1, 32], strides = [1, 1]} : vector<4x32xf32> to vector<1x32xf32>
    %165 = vector.broadcast %164 : vector<1x32xf32> to vector<8x32xf32>
    %166 = arith.mulf %132, %165 : vector<8x32xf32>
    %167 = arith.truncf %166 : vector<8x32xf32> to vector<8x32xbf16>
    %168 = arith.truncf %163 : vector<8x8xf32> to vector<8x8xbf16>
    %cst_43 = arith.constant dense<0.000000e+00> : vector<8x32xf32>
    %169 = tpu.matmul %168, %167, %cst_43 {dimension_numbers = #tpu.dot_dimension_numbers<[1], [0], [0], [1], [0, 0, 1, 1], [], []>} : vector<8x8xbf16>, vector<8x32xbf16>, vector<8x32xf32> -> vector<8x32xf32>
    %170 = vector.extract_strided_slice %135 {offsets = [0, 1], sizes = [8, 1], strides = [1, 1]} : vector<8x4xf32> to vector<8x1xf32>
    %171 = vector.extract_strided_slice %134 {offsets = [1, 0], sizes = [1, 8], strides = [1, 1]} : vector<4x8xf32> to vector<1x8xf32>
    %172 = vector.broadcast %170 : vector<8x1xf32> to vector<8x8xf32>
    %173 = vector.broadcast %171 : vector<1x8xf32> to vector<8x8xf32>
    %174 = arith.addf %172, %173 : vector<8x8xf32>
    %cst_44 = arith.constant 2.000000e-01 : f32
    %175 = vector.broadcast %cst_44 : f32 to vector<8x8xf32>
    %176 = arith.mulf %175, %174 : vector<8x8xf32>
    %177 = arith.maximumf %174, %176 : vector<8x8xf32>
    %178 = arith.addf %177, %140 : vector<8x8xf32>
    %cst_45 = arith.constant dense<0xFF800000> : vector<8xf32>
    %179 = vector.multi_reduction <maximumf>, %178, %cst_45 [1] : vector<8x8xf32> to vector<8xf32>
    %180 = vector.shape_cast %179 : vector<8xf32> to vector<8x1xf32>
    %181 = vector.broadcast %180 : vector<8x1xf32> to vector<8x8xf32>
    %182 = arith.subf %178, %181 : vector<8x8xf32>
    %183 = math.exp %182 : vector<8x8xf32>
    %cst_46 = arith.constant dense<0.000000e+00> : vector<8xf32>
    %184 = vector.multi_reduction <add>, %183, %cst_46 [1] : vector<8x8xf32> to vector<8xf32>
    %185 = vector.shape_cast %184 : vector<8xf32> to vector<8x1xf32>
    %186 = tpu.reciprocal %185 {approx = true} : vector<8x1xf32> -> vector<8x1xf32>
    %187 = vector.broadcast %186 : vector<8x1xf32> to vector<8x8xf32>
    %188 = arith.mulf %183, %187 : vector<8x8xf32>
    %189 = vector.extract_strided_slice %9 {offsets = [1, 0], sizes = [1, 32], strides = [1, 1]} : vector<4x32xf32> to vector<1x32xf32>
    %190 = vector.broadcast %189 : vector<1x32xf32> to vector<8x32xf32>
    %191 = arith.mulf %132, %190 : vector<8x32xf32>
    %192 = arith.truncf %191 : vector<8x32xf32> to vector<8x32xbf16>
    %193 = arith.truncf %188 : vector<8x8xf32> to vector<8x8xbf16>
    %cst_47 = arith.constant dense<0.000000e+00> : vector<8x32xf32>
    %194 = tpu.matmul %193, %192, %cst_47 {dimension_numbers = #tpu.dot_dimension_numbers<[1], [0], [0], [1], [0, 0, 1, 1], [], []>} : vector<8x8xbf16>, vector<8x32xbf16>, vector<8x32xf32> -> vector<8x32xf32>
    %195 = arith.addf %169, %194 : vector<8x32xf32>
    %196 = vector.extract_strided_slice %135 {offsets = [0, 2], sizes = [8, 1], strides = [1, 1]} : vector<8x4xf32> to vector<8x1xf32>
    %197 = vector.extract_strided_slice %134 {offsets = [2, 0], sizes = [1, 8], strides = [1, 1]} : vector<4x8xf32> to vector<1x8xf32>
    %198 = vector.broadcast %196 : vector<8x1xf32> to vector<8x8xf32>
    %199 = vector.broadcast %197 : vector<1x8xf32> to vector<8x8xf32>
    %200 = arith.addf %198, %199 : vector<8x8xf32>
    %cst_48 = arith.constant 2.000000e-01 : f32
    %201 = vector.broadcast %cst_48 : f32 to vector<8x8xf32>
    %202 = arith.mulf %201, %200 : vector<8x8xf32>
    %203 = arith.maximumf %200, %202 : vector<8x8xf32>
    %204 = arith.addf %203, %140 : vector<8x8xf32>
    %cst_49 = arith.constant dense<0xFF800000> : vector<8xf32>
    %205 = vector.multi_reduction <maximumf>, %204, %cst_49 [1] : vector<8x8xf32> to vector<8xf32>
    %206 = vector.shape_cast %205 : vector<8xf32> to vector<8x1xf32>
    %207 = vector.broadcast %206 : vector<8x1xf32> to vector<8x8xf32>
    %208 = arith.subf %204, %207 : vector<8x8xf32>
    %209 = math.exp %208 : vector<8x8xf32>
    %cst_50 = arith.constant dense<0.000000e+00> : vector<8xf32>
    %210 = vector.multi_reduction <add>, %209, %cst_50 [1] : vector<8x8xf32> to vector<8xf32>
    %211 = vector.shape_cast %210 : vector<8xf32> to vector<8x1xf32>
    %212 = tpu.reciprocal %211 {approx = true} : vector<8x1xf32> -> vector<8x1xf32>
    %213 = vector.broadcast %212 : vector<8x1xf32> to vector<8x8xf32>
    %214 = arith.mulf %209, %213 : vector<8x8xf32>
    %215 = vector.extract_strided_slice %9 {offsets = [2, 0], sizes = [1, 32], strides = [1, 1]} : vector<4x32xf32> to vector<1x32xf32>
    %216 = vector.broadcast %215 : vector<1x32xf32> to vector<8x32xf32>
    %217 = arith.mulf %132, %216 : vector<8x32xf32>
    %218 = arith.truncf %217 : vector<8x32xf32> to vector<8x32xbf16>
    %219 = arith.truncf %214 : vector<8x8xf32> to vector<8x8xbf16>
    %cst_51 = arith.constant dense<0.000000e+00> : vector<8x32xf32>
    %220 = tpu.matmul %219, %218, %cst_51 {dimension_numbers = #tpu.dot_dimension_numbers<[1], [0], [0], [1], [0, 0, 1, 1], [], []>} : vector<8x8xbf16>, vector<8x32xbf16>, vector<8x32xf32> -> vector<8x32xf32>
    %221 = arith.addf %195, %220 : vector<8x32xf32>
    %222 = vector.extract_strided_slice %135 {offsets = [0, 3], sizes = [8, 1], strides = [1, 1]} : vector<8x4xf32> to vector<8x1xf32>
    %223 = vector.extract_strided_slice %134 {offsets = [3, 0], sizes = [1, 8], strides = [1, 1]} : vector<4x8xf32> to vector<1x8xf32>
    %224 = vector.broadcast %222 : vector<8x1xf32> to vector<8x8xf32>
    %225 = vector.broadcast %223 : vector<1x8xf32> to vector<8x8xf32>
    %226 = arith.addf %224, %225 : vector<8x8xf32>
    %cst_52 = arith.constant 2.000000e-01 : f32
    %227 = vector.broadcast %cst_52 : f32 to vector<8x8xf32>
    %228 = arith.mulf %227, %226 : vector<8x8xf32>
    %229 = arith.maximumf %226, %228 : vector<8x8xf32>
    %230 = arith.addf %229, %140 : vector<8x8xf32>
    %cst_53 = arith.constant dense<0xFF800000> : vector<8xf32>
    %231 = vector.multi_reduction <maximumf>, %230, %cst_53 [1] : vector<8x8xf32> to vector<8xf32>
    %232 = vector.shape_cast %231 : vector<8xf32> to vector<8x1xf32>
    %233 = vector.broadcast %232 : vector<8x1xf32> to vector<8x8xf32>
    %234 = arith.subf %230, %233 : vector<8x8xf32>
    %235 = math.exp %234 : vector<8x8xf32>
    %cst_54 = arith.constant dense<0.000000e+00> : vector<8xf32>
    %236 = vector.multi_reduction <add>, %235, %cst_54 [1] : vector<8x8xf32> to vector<8xf32>
    %237 = vector.shape_cast %236 : vector<8xf32> to vector<8x1xf32>
    %238 = tpu.reciprocal %237 {approx = true} : vector<8x1xf32> -> vector<8x1xf32>
    %239 = vector.broadcast %238 : vector<8x1xf32> to vector<8x8xf32>
    %240 = arith.mulf %235, %239 : vector<8x8xf32>
    %241 = vector.extract_strided_slice %9 {offsets = [3, 0], sizes = [1, 32], strides = [1, 1]} : vector<4x32xf32> to vector<1x32xf32>
    %242 = vector.broadcast %241 : vector<1x32xf32> to vector<8x32xf32>
    %243 = arith.mulf %132, %242 : vector<8x32xf32>
    %244 = arith.truncf %243 : vector<8x32xf32> to vector<8x32xbf16>
    %245 = arith.truncf %240 : vector<8x8xf32> to vector<8x8xbf16>
    %cst_55 = arith.constant dense<0.000000e+00> : vector<8x32xf32>
    %246 = tpu.matmul %245, %244, %cst_55 {dimension_numbers = #tpu.dot_dimension_numbers<[1], [0], [0], [1], [0, 0, 1, 1], [], []>} : vector<8x8xbf16>, vector<8x32xbf16>, vector<8x32xf32> -> vector<8x32xf32>
    %247 = arith.addf %221, %246 : vector<8x32xf32>
    %cst_56 = arith.constant 0.000000e+00 : f32
    %248 = vector.broadcast %cst_56 : f32 to vector<8x32xf32>
    %249 = arith.maximumf %247, %248 : vector<8x32xf32>
    %cst_57 = arith.constant 0.000000e+00 : f32
    %250 = vector.shape_cast %144 : vector<8x1xi1> to vector<8x1xi1>
    %251 = vector.broadcast %250 : vector<8x1xi1> to vector<8x32xi1>
    %252 = vector.broadcast %cst_57 : f32 to vector<8x32xf32>
    %253 = arith.select %251, %249, %252 : vector<8x32xi1>, vector<8x32xf32>
    %c0_58 = arith.constant 0 : index
    %c0_59 = arith.constant 0 : index
    %254 = vector.load %arg7[%c0_58, %c0_59] : memref<32x32xbf16, #tpu.memory_space<vmem>>, vector<32x32xbf16>
    %c0_60 = arith.constant 0 : index
    %c0_61 = arith.constant 0 : index
    %255 = vector.load %arg8[%c0_60, %c0_61] : memref<1x32xf32, #tpu.memory_space<vmem>>, vector<1x32xf32>
    %c0_62 = arith.constant 0 : index
    %c0_63 = arith.constant 0 : index
    %256 = vector.load %arg9[%c0_62, %c0_63] : memref<1x32xf32, #tpu.memory_space<vmem>>, vector<1x32xf32>
    %257 = arith.truncf %131 : vector<8x32xf32> to vector<8x32xbf16>
    %cst_64 = arith.constant dense<0.000000e+00> : vector<8x32xf32>
    %258 = tpu.matmul %257, %254, %cst_64 {dimension_numbers = #tpu.dot_dimension_numbers<[1], [0], [0], [1], [0, 0, 1, 1], [], []>} : vector<8x32xbf16>, vector<32x32xbf16>, vector<8x32xf32> -> vector<8x32xf32>
    %259 = vector.broadcast %255 : vector<1x32xf32> to vector<8x32xf32>
    %260 = arith.addf %258, %259 : vector<8x32xf32>
    %261 = math.tanh %260 : vector<8x32xf32>
    %cst_65 = arith.constant dense<0.000000e+00> : vector<32xf32>
    %262 = vector.multi_reduction <add>, %261, %cst_65 [0] : vector<8x32xf32> to vector<32xf32>
    %263 = vector.shape_cast %262 : vector<32xf32> to vector<1x32xf32>
    %cst_66 = arith.constant 8.000000e+00 : f32
    %264 = vector.broadcast %cst_66 : f32 to vector<1x32xf32>
    %265 = arith.divf %263, %264 : vector<1x32xf32>
    %266 = arith.mulf %256, %265 : vector<1x32xf32>
    %cst_67 = arith.constant dense<0.000000e+00> : vector<1xf32>
    %267 = vector.multi_reduction <add>, %266, %cst_67 [1] : vector<1x32xf32> to vector<1xf32>
    %268 = vector.shape_cast %267 : vector<1xf32> to vector<1x1xf32>
    %269 = arith.truncf %253 : vector<8x32xf32> to vector<8x32xbf16>
    %cst_68 = arith.constant dense<0.000000e+00> : vector<8x32xf32>
    %270 = tpu.matmul %269, %254, %cst_68 {dimension_numbers = #tpu.dot_dimension_numbers<[1], [0], [0], [1], [0, 0, 1, 1], [], []>} : vector<8x32xbf16>, vector<32x32xbf16>, vector<8x32xf32> -> vector<8x32xf32>
    %271 = vector.broadcast %255 : vector<1x32xf32> to vector<8x32xf32>
    %272 = arith.addf %270, %271 : vector<8x32xf32>
    %273 = math.tanh %272 : vector<8x32xf32>
    %cst_69 = arith.constant dense<0.000000e+00> : vector<32xf32>
    %274 = vector.multi_reduction <add>, %273, %cst_69 [0] : vector<8x32xf32> to vector<32xf32>
    %275 = vector.shape_cast %274 : vector<32xf32> to vector<1x32xf32>
    %cst_70 = arith.constant 8.000000e+00 : f32
    %276 = vector.broadcast %cst_70 : f32 to vector<1x32xf32>
    %277 = arith.divf %275, %276 : vector<1x32xf32>
    %278 = arith.mulf %256, %277 : vector<1x32xf32>
    %cst_71 = arith.constant dense<0.000000e+00> : vector<1xf32>
    %279 = vector.multi_reduction <add>, %278, %cst_71 [1] : vector<1x32xf32> to vector<1xf32>
    %280 = vector.shape_cast %279 : vector<1xf32> to vector<1x1xf32>
    %281 = arith.maximumf %268, %280 : vector<1x1xf32>
    %282 = arith.subf %268, %281 : vector<1x1xf32>
    %283 = math.exp %282 : vector<1x1xf32>
    %284 = arith.subf %280, %281 : vector<1x1xf32>
    %285 = math.exp %284 : vector<1x1xf32>
    %286 = arith.addf %283, %285 : vector<1x1xf32>
    %cst_72 = arith.constant 1.000000e+00 : f32
    %287 = vector.broadcast %cst_72 : f32 to vector<1x1xf32>
    %288 = arith.divf %287, %286 : vector<1x1xf32>
    %289 = arith.mulf %283, %288 : vector<1x1xf32>
    %290 = vector.broadcast %289 : vector<1x1xf32> to vector<8x32xf32>
    %291 = arith.mulf %131, %290 : vector<8x32xf32>
    %292 = arith.mulf %285, %288 : vector<1x1xf32>
    %293 = vector.broadcast %292 : vector<1x1xf32> to vector<8x32xf32>
    %294 = arith.mulf %253, %293 : vector<8x32xf32>
    %295 = arith.addf %291, %294 : vector<8x32xf32>
    %296 = arith.truncf %295 : vector<8x32xf32> to vector<8x32xbf16>
    %c0_73 = arith.constant 0 : index
    %c0_74 = arith.constant 0 : index
    %297 = vector.load %arg10[%c0_73, %c0_74] : memref<32x4xbf16, #tpu.memory_space<vmem>>, vector<32x4xbf16>
    %cst_75 = arith.constant dense<0.000000e+00> : vector<8x4xf32>
    %298 = tpu.matmul %296, %297, %cst_75 {dimension_numbers = #tpu.dot_dimension_numbers<[1], [0], [0], [1], [0, 0, 1, 1], [], []>} : vector<8x32xbf16>, vector<32x4xbf16>, vector<8x4xf32> -> vector<8x4xf32>
    %c0_76 = arith.constant 0 : index
    %c0_77 = arith.constant 0 : index
    %299 = vector.load %arg11[%c0_76, %c0_77] : memref<1x4xf32, #tpu.memory_space<vmem>>, vector<1x4xf32>
    %300 = vector.broadcast %299 : vector<1x4xf32> to vector<8x4xf32>
    %301 = arith.addf %298, %300 : vector<8x4xf32>
    %c0_78 = arith.constant 0 : index
    %c0_79 = arith.constant 0 : index
    %302 = vector.load %arg12[%c0_78, %c0_79] : memref<8x4xf32, #tpu.memory_space<vmem>>, vector<8x4xf32>
    tpu.vector_store %arg12[%c0_78, %c0_79], %301 {strides = array<i32>} : memref<8x4xf32, #tpu.memory_space<vmem>>, vector<8x4xf32>,
    return
  }
}

</mosaic_0001>

<bundles_post_ra>
// kernel: tpu_custom_call.1
= control target key start
LH: loop header
LB: loop body
LE: loop exit
PB: predicated region body
PF: predicated region fallthrough
CT: control target
= control target key end

     0   :  { %17 = vsyncpa [#allocation3], 0  ;;  %s1440_s21 = smov [#allocation2]   ;;  %s1782_s0 = inlined_call_operand.vmem [shape: bf16[24,32], index: 0, kind: input, shape index: {}]   ;;  %s1783_s1 = inlined_call_operand.vmem [shape: bf16[32,64], index: 1, kind: input, shape index: {}]   ;;  %s1784_s2 = inlined_call_operand.vmem [shape: f32[1,64], index: 2, kind: input, shape index: {}]   ;;  %s1785_s3 = inlined_call_operand.vmem [shape: bf16[64,16], index: 3, kind: input, shape index: {}]   ;;  %s1786_s4 = inlined_call_operand.vmem [shape: f32[8,16], index: 4, kind: input, shape index: {}]   ;;  %s1787_s5 = inlined_call_operand.hbm [shape: f32[8,8], index: 5, kind: input, shape index: {}]   ;;  %s1788_s6 = inlined_call_operand.vmem [shape: f32[4,32], index: 6, kind: input, shape index: {}]   ;;  %s1789_s7 = inlined_call_operand.vmem [shape: bf16[32,32], index: 7, kind: input, shape index: {}]   ;;  %s1790_s8 = inlined_call_operand.vmem [shape: f32[1,32], index: 8, kind: input, shape index: {}]   ;;  %s1791_s9 = inlined_call_operand.vmem [shape: f32[1,32], index: 9, kind: input, shape index: {}]   ;;  %s1792_s10 = inlined_call_operand.vmem [shape: bf16[32,4], index: 10, kind: input, shape index: {}]   ;;  %s1793_s11 = inlined_call_operand.vmem [shape: f32[1,4], index: 11, kind: input, shape index: {}]   ;;  %s1794_s12 = inlined_call_operand.vmem [shape: f32[8,4], index: 12, kind: output, shape index: {}]  }
   0x1   :  { %s34_s22 = sshll.u32 %s1440_s21, 4  ;;  %s35_s22 = int_to_ptr.vmem [resolvable:$true] %s34_s22 }
   0x2   :  { %s1426_s23 = scalar_lea.vmem %s35_s22, 128  ;;  %p1431_p1 = scmp.lt.s32.totalorder %s35_s22, %s35_s22 }
   0x3   :  { %p1427_p0 = scmp.ne.s32.totalorder %s35_s22, %s1426_s23  ;;  %p1432_p2 = scmp.lt.s32.totalorder %s1426_s23, %s1426_s23 }
   0x5   :  { %p1433_p3 = por %p1432_p2, %p1431_p1 }
   0x7   :  { %p1434_p4 = pnand %p1433_p3, %p1427_p0 }
   0x9   :  { %1437 = shalt.err (!%p1434_p4)
}
   0xa   :  { %37 = dma.hbm_to_vmem [thread:$0]  %s1787_s5, 128, %s35_s22, [#allocation3]  }
   0xb   :  { %1438 = dma.done.wait [#allocation3], 128  }
   0xc   :  { %1439 = vsyncadd [#allocation3], 4294967168  ;;  %v1364_v0 = vld [vmem:[%s1783_s1 + $0x8] sm:$0xff]   ;;  %v1365_v1 = vld [vmem:[%s1783_s1] sm:$0xff]   ;;  %vm88_vm0 = vcmask 261120   ;;  %vm177_vm1 = vcmask 523264   ;;  %v278_v34 = vlaneseq }
   0xd   :  { %1250 = vmatprep.subr.bf16.mxu0 %v1364_v0  ;;  %v1366_v2 = vld [vmem:[%s1782_s0] sm:$0xff]   ;;  %v1367_v3 = vld [vmem:[%s1782_s0 + $0x8] ss:$0 sps:$4 sm:$0xff]   ;;  %v1368_v4 = vld [vmem:[%s1785_s3 + $0x18] sm:$0xff]   ;;  %v1441_v18 = vmov 4   ;;  %v1442_v19 = vmov 5  }
   0xe   :  { %1251 = vmatpush3.bf16.msra.mxu0 %v1364_v0  ;;  %1254 = vmatprep.mubr.msk.bf16.mxu0 %vm88_vm0, %v1366_v2  ;;  %v1369_v5 = vld [vmem:[%s1785_s3 + $0x10] sm:$0xff]   ;;  %v1370_v6 = vld [vmem:[%s1785_s3 + $0x8] sm:$0xff]   ;;  %v1371_v7 = vld [vmem:[%s1785_s3] sm:$0xff]   ;;  %v1444_v23 = vmov 6   ;;  %v1445_v24 = vmov 13   ;;  %v1446_v25 = vmov 7  }
   0xf   :  { %1252 = vmatprep.subr.bf16.mxu0 %v1365_v1  ;;  %1258 = vmatprep.subr.bf16.mxu1 %v1368_v4  ;;  %v1183_v10 = vld [vmem:[%s1784_s2] ss:$0 sm:$0xff]  ;;  %s1443_s2 = smov 120   ;;  %v1447_v26 = vmov 14   ;;  %v1448_v27 = vmov 12   ;;  %v1449_v28 = vmov 15  }
  0x10   :  { %1259 = vmatpush3.bf16.msra.mxu1 %v1368_v4  ;;  %1357 = vset.pattern.permute.xlu1 %v1441_v18  ;;  %v279_v35 = vshrl.u32 %v278_v34, 7  ;;  %v1564_v37 = vld [vmem:[%s1786_s4] sm:$0xff]  ;;  %vm268_vm2 = vcmask 130048   ;;  %vm646_vm3 = vcmask 64512   ;;  %s1450_s25 = smov 32   ;;  %vm1452_vm4 = vmmov 0  }
  0x11   :  { %1260 = vmatprep.subr.bf16.mxu1 %v1369_v5  ;;  %1356 = vset.pattern.permute.xlu0 %v1442_v19  ;;  %v1196_v43 = vadd.f32 -1.0, %v1564_v37  ;;  %v232_v34 = vld [vmem:[%s1788_s6] sm:$0xf]  ;;  %s1453_s6 = smov 96   ;;  %vm706_vm5 = vcmask 1043456   ;;  %vm1025_vm8 = vcmask 253952  }
  0x12   :  { %1253 = vmatpush3.bf16.msra.mxu0 %v1365_v1  ;;  %v1566_v38 = vsub.s32 0, %v279_v35  ;;  %v1568_v39 = vsub.s32 1, %v279_v35  ;;  %v1570_v40 = vsub.s32 2, %v279_v35  ;;  %v1572_v41 = vsub.s32 3, %v279_v35 }
  0x13   :  { %v267_v53 = vmul.f32 1e+30, %v1196_v43  ;;  %vm1176_vm9 = vcmask 31744  }
  0x14   :  { %1261 = vmatpush3.bf16.msra.mxu1 %v1369_v5  ;;  %v1605_v35 = vrot.slane %v232_v34, %v1568_v39 }
  0x15   :  { %1255 = vmatmul.mubr.msk.bf16.vlgmr.msra.gmra.mxu0 %vm88_vm0, %v1367_v3  ;;  %1262 = vmatprep.subr.bf16.mxu1 %v1370_v6 }
  0x18   :  { %1263 = vmatpush3.bf16.msra.mxu1 %v1370_v6 }
  0x19   :  { %1264 = vmatprep.subr.bf16.mxu1 %v1371_v7 }
  0x1c   :  { %1265 = vmatpush3.bf16.msra.mxu1 %v1371_v7 }
  0xd5   :  { %v1256_v8 = vpop.f32.mrf.mxu0 }
  0xd6   :  { %v1551_v12 = vadd.f32 %v1256_v8, %v1183_v10 }
  0xd7   :  { %v129_v9 = vpop.f32.mrf.mxu0 }
  0xd8   :  { %v1553_v14 = vadd.f32 %v1183_v10, %v129_v9  ;;  %v144_v17 = vpack.c.bf16 %v1551_v12, %v1551_v12  ;;  %v1586_v9 = vld [vmem:[#allocation2] sm:$0xff] }
  0xd9   :  { %v1257_v11 = vpop.f32.mrf.mxu0 }
  0xda   :  { %v1201_v11 = vadd.f32 -1.0, %v1586_v9 }
  0xdb   :  { %v132_v13 = vpop.f32.mrf.mxu0 }
  0xdc   :  { %v1555_v15 = vadd.f32 %v1183_v10, %v132_v13 }
  0xde   :  { %v143_v16 = vpack.c.bf16 %v1555_v15, %v1553_v14 }
  0xe0   :  { %1266 = vmatprep.mubr.msk.bf16.mxu1 %vm177_vm1, %v143_v16 }
  0xe1   :  { %1267 = vmatmul.mubr.msk.bf16.vlgmr.msra.gmra.mxu1 %vm177_vm1, %v144_v17 }
 0x1a1   :  { %v1268_v20 = vpop.f32.mrf.mxu1 }
 0x1a3   :  { %v218_v21 = vpop.f32.mrf.mxu1 }
 0x1a4   :  { %275 = vperm.xlu1 %1357, %v218_v21   ;;  %608 = vrot.lane.b32.xlu0 %v218_v21, %s1443_s2 }
 0x1a5   :  { %v1269_v22 = vpop.f32.mrf.mxu1 }
 0x1a7   :  { %v221_v29 = vpop.f32.mrf.mxu1 }
 0x1a8   :  { %1358 = vset.pattern.permute.xlu1 %v1444_v23  ;;  %310 = vperm.xlu0 %1356, %v218_v21  }
 0x1a9   :  { %439 = vperm.xlu1 %1358, %v218_v21  }
 0x1ac   :  { %1360 = vset.pattern.permute.xlu0 %v1445_v24 }
 0x1ad   :  { %1359 = vset.pattern.permute.xlu1 %v1446_v25  ;;  %678 = vperm.xlu0 %1360, %v218_v21  }
 0x1ae   :  { %522 = vperm.xlu1 %1359, %v218_v21  }
 0x1b1   :  { %1362 = vset.pattern.permute.xlu0 %v1447_v26 }
 0x1b2   :  { %1361 = vset.pattern.permute.xlu1 %v1448_v27  ;;  %797 = vperm.xlu0 %1362, %v218_v21  }
 0x1b3   :  { %652 = vperm.xlu1 %1361, %v218_v21  }
 0x1b6   :  { %1363 = vset.pattern.permute.xlu0 %v1449_v28 }
 0x1b7   :  { %870 = vperm.xlu0 %1363, %v218_v21   ;;  %v645_v21 = vmul.f32 1e+30, %v1201_v11 }
 0x1dc   :  { %233 = vxpose.xlu1.b32.start [1/2] (short) (narrow) %v221_v29, 8 }
 0x1e0   :  { %234 = vxpose.xlu1.b32.end [2/2] (short) (narrow) %v1268_v20, 8 }
 0x216   :  { %v609_v30 = vpop.permute.xlu0 %608 }
 0x217   :  { %611 = vxpose.xlu0.b32.start.end [1/1] (short) (narrow) %v609_v30, 8 }
 0x21f   :  { %v276_v31 = vpop.permute.xlu1 %275 }
 0x223   :  { %v311_v48 = vpop.permute.xlu0 %310 }
 0x224   :  { %v440_v32 = vpop.permute.xlu1 %439 }
 0x228   :  { %v679_v6 = vpop.permute.xlu0 %678 }
 0x229   :  { %v523_v33 = vpop.permute.xlu1 %522 }
 0x22d   :  { %v798_v7 = vpop.permute.xlu0 %797 }
 0x22e   :  { %v653_v36 = vpop.permute.xlu1 %652 }
 0x232   :  { %v871_v8 = vpop.permute.xlu0 %870 }
 0x258   :  { %v249_v42 = vpop.trf.xlu1 }
 0x259   :  { %v281_v44 = vrot.slane %v249_v42, %v1566_v38  ;;  %v316_v45 = vrot.slane %v249_v42, %v1568_v39  ;;  %v445_v46 = vrot.slane %v249_v42, %v1570_v40  ;;  %v528_v47 = vrot.slane %v249_v42, %v1572_v41 }
 0x25b   :  { %v317_v49 = vadd.f32 %v316_v45, %v311_v48  ;;  %v282_v50 = vadd.f32 %v281_v44, %v276_v31  ;;  %v446_v51 = vadd.f32 %v445_v46, %v440_v32  ;;  %v529_v52 = vadd.f32 %v528_v47, %v523_v33 }
 0x25c   :  { %v1622_v48 = vrot.slane %v232_v34, %v1572_v41 }
 0x25d   :  { %v318_v54 = vmul.f32 0.2, %v317_v49  ;;  %v283_v55 = vmul.f32 0.2, %v282_v50  ;;  %v447_v56 = vmul.f32 0.2, %v446_v51 }
 0x25e   :  { %v530_v60 = vmul.f32 0.2, %v529_v52 }
 0x25f   :  { %v319_v57 = vmax.f32 %v317_v49, %v318_v54  ;;  %v284_v58 = vmax.f32 %v282_v50, %v283_v55  ;;  %v448_v59 = vmax.f32 %v446_v51, %v447_v56 }
 0x260   :  { %v531_v2 = vmax.f32 %v529_v52, %v530_v60 }
 0x261   :  { %v320_v61 = vadd.f32 %v319_v57, %v267_v53  ;;  %v1579_v62 = vadd.f32 %v284_v58, %v267_v53  ;;  %v449_v1 = vadd.f32 %v448_v59, %v267_v53 }
 0x262   :  { %v532_v4 = vadd.f32 %v531_v2, %v267_v53 }
 0x263   :  { %v321_v63 = vsel %vm268_vm2, %v320_v61, -inf  ;;  %v286_v0 = vsel %vm268_vm2, %v1579_v62, -inf  ;;  %v450_v3 = vsel %vm268_vm2, %v449_v1, -inf }
 0x264   :  { %322 = vmax.xlane.f32.xlu1 %v321_v63  ;;  %287 = vmax.xlane.f32.xlu0 %v286_v0  ;;  %v533_v5 = vsel %vm268_vm2, %v532_v4, -inf  ;;  %v1451_v63 = vmov 0.0  }
 0x265   :  { %1270 = vmatprep.subr.bf16.mxu0 %v1451_v63  ;;  %1282 = vmatprep.subr.bf16.mxu1 %v1451_v63 }
 0x266   :  { %1272 = vmatprep.mubr.msk.bf16.mxu0 %vm1452_vm4, %v1451_v63  ;;  %1284 = vmatprep.mubr.msk.bf16.mxu1 %vm1452_vm4, %v1451_v63 }
 0x268   :  { %451 = vmax.xlane.f32.xlu1 %v450_v3 }
 0x26c   :  { %534 = vmax.xlane.f32.xlu1 %v533_v5 }
 0x293   :  { %v627_v10 = vpop.trf.xlu0 }
 0x294   :  { %v658_v13 = vrot.slane %v627_v10, %v1566_v38  ;;  %v684_v16 = vrot.slane %v627_v10, %v1568_v39  ;;  %v876_v17 = vrot.slane %v627_v10, %v1572_v41  ;;  %v803_v42 = vrot.slane %v627_v10, %v1570_v40 }
 0x295   :  { %v1618_v39 = vrot.slane %v232_v34, %v1570_v40 }
 0x296   :  { %v685_v18 = vadd.f32 %v684_v16, %v679_v6  ;;  %v659_v19 = vadd.f32 %v658_v13, %v653_v36  ;;  %v877_v20 = vadd.f32 %v876_v17, %v871_v8  ;;  %v1609_v36 = vrot.slane %v232_v34, %v1566_v38 }
 0x297   :  { %v804_v43 = vadd.f32 %v803_v42, %v798_v7 }
 0x298   :  { %v686_v22 = vmul.f32 0.2, %v685_v18  ;;  %v660_v23 = vmul.f32 0.2, %v659_v19  ;;  %v878_v24 = vmul.f32 0.2, %v877_v20 }
 0x299   :  { %v805_v44 = vmul.f32 0.2, %v804_v43 }
 0x29a   :  { %v687_v25 = vmax.f32 %v685_v18, %v686_v22  ;;  %v661_v26 = vmax.f32 %v659_v19, %v660_v23  ;;  %v879_v27 = vmax.f32 %v877_v20, %v878_v24 }
 0x29b   :  { %v806_v45 = vmax.f32 %v804_v43, %v805_v44 }
 0x29c   :  { %v1592_v28 = vadd.f32 %v687_v25, %v645_v21  ;;  %v662_v29 = vadd.f32 %v661_v26, %v645_v21  ;;  %v1597_v32 = vadd.f32 %v879_v27, %v645_v21 }
 0x29d   :  { %v1613_v46 = vadd.f32 %v806_v45, %v645_v21 }
 0x29e   :  { %v689_v30 = vsel %vm646_vm3, %v1592_v28, -inf  ;;  %v663_v31 = vsel %vm646_vm3, %v662_v29, -inf  ;;  %v881_v33 = vsel %vm646_vm3, %v1597_v32, -inf }
 0x29f   :  { %690 = vmax.xlane.f32.xlu1 %v689_v30  ;;  %664 = vmax.xlane.f32.xlu0 %v663_v31  ;;  %v808_v47 = vsel %vm646_vm3, %v1613_v46, -inf }
 0x2a3   :  { %882 = vmax.xlane.f32.xlu0 %v881_v33 }
 0x2b0   :  { %337 = vrot.lane.b32.xlu1 %v1605_v35, %s1450_s25 }
 0x2b9   :  { %302 = vrot.lane.b32.xlu0 %v1609_v36, %s1450_s25 }
 0x2d4   :  { %809 = vmax.xlane.f32.xlu1 %v808_v47 }
 0x2e5   :  { %466 = vrot.lane.b32.xlu1 %v1618_v39, %s1450_s25 }
 0x2e9   :  { %549 = vrot.lane.b32.xlu1 %v1622_v48, %s1450_s25 }
 0x2ed   :  { %v323_v49 = vpop.xlane.xlu1 %322  ;;  %v288_v0 = vpop.xlane.xlu0 %287 }
 0x2ee   :  { %v324_v50 = vsub.f32 %v320_v61, %v323_v49  ;;  %v289_v11 = vsub.f32 %v1579_v62, %v288_v0 }
 0x2f0   :  { %v325_v51 = vmul.f32 1.442695, %v324_v50  ;;  %v290_v16 = vmul.f32 1.442695, %v289_v11 }
 0x2f1   :  { %v452_v52 = vpop.xlane.xlu1 %451 }
 0x2f2   :  { %1376 = vpow2.f32 %v325_v51  ;;  %v453_v53 = vsub.f32 %v449_v1, %v452_v52 }
 0x2f4   :  { %v454_v54 = vmul.f32 1.442695, %v453_v53 }
 0x2f5   :  { %v535_v55 = vpop.xlane.xlu1 %534 }
 0x2f6   :  { %1378 = vpow2.f32 %v454_v54  ;;  %v536_v56 = vsub.f32 %v532_v4, %v535_v55  ;;  %v269_v54 = vsel %vm268_vm2, %v1564_v37, -inf }
 0x2f8   :  { %v537_v57 = vmul.f32 1.442695, %v536_v56 }
 0x2fa   :  { %1380 = vpow2.f32 %v537_v57 }
 0x2ff   :  { %v1625_v40 = vpop.eup %1376 }
 0x300   :  { %v327_v41 = vsel %vm268_vm2, %v1625_v40, 0.0 }
 0x301   :  { %328 = vadd.xlane.f32.xlu0 %v327_v41 }
 0x303   :  { %v1629_v58 = vpop.eup %1378 }
 0x304   :  { %v456_v59 = vsel %vm268_vm2, %v1629_v58, 0.0 }
 0x305   :  { %457 = vadd.xlane.f32.xlu0 %v456_v59 }
 0x307   :  { %v1633_v60 = vpop.eup %1380 }
 0x308   :  { %v539_v61 = vsel %vm268_vm2, %v1633_v60, 0.0 }
 0x309   :  { %540 = vadd.xlane.f32.xlu0 %v539_v61 }
 0x328   :  { %v691_v1 = vpop.xlane.xlu1 %690  ;;  %v665_v2 = vpop.xlane.xlu0 %664 }
 0x329   :  { %v666_v3 = vsub.f32 %v662_v29, %v665_v2  ;;  %v692_v17 = vsub.f32 %v1592_v28, %v691_v1 }
 0x32b   :  { %v667_v4 = vmul.f32 1.442695, %v666_v3  ;;  %v693_v18 = vmul.f32 1.442695, %v692_v17 }
 0x32c   :  { %v338_v5 = vpop.permute.xlu1 %337  ;;  %v883_v22 = vpop.xlane.xlu0 %882 }
 0x32d   :  { %v340_v6 = vmul.f32 %v338_v5, %v1555_v15  ;;  %v341_v7 = vmul.f32 %v338_v5, %v1551_v12  ;;  %1382 = vpow2.f32 %v667_v4  ;;  %v884_v23 = vsub.f32 %v1597_v32, %v883_v22 }
 0x32e   :  { %1384 = vpow2.f32 %v290_v16 }
 0x32f   :  { %v342_v8 = vpack.c.bf16 %v341_v7, %v340_v6  ;;  %1386 = vpow2.f32 %v693_v18  ;;  %v885_v26 = vmul.f32 1.442695, %v884_v23 }
 0x330   :  { %v303_v47 = vpop.permute.xlu0 %302 }
 0x331   :  { %345 = vrot.lane.b32.xlu1 %v342_v8, %s1453_s6  ;;  %v305_v49 = vmul.f32 %v303_v47, %v1555_v15  ;;  %v306_v50 = vmul.f32 %v303_v47, %v1551_v12 }
 0x333   :  { %v307_v51 = vpack.c.bf16 %v306_v50, %v305_v49 }
 0x33a   :  { %v1646_v10 = vpop.eup %1382 }
 0x33b   :  { %v669_v13 = vsel %vm646_vm3, %v1646_v10, 0.0  ;;  %v1652_v19 = vpop.eup %1384 }
 0x33c   :  { %670 = vadd.xlane.f32.xlu0 %v669_v13  ;;  %v292_v20 = vsel %vm268_vm2, %v1652_v19, 0.0  ;;  %v1656_v21 = vpop.eup %1386 }
 0x33d   :  { %v695_v62 = vsel %vm646_vm3, %v1656_v21, 0.0 }
 0x355   :  { %293 = vadd.xlane.f32.xlu1 %v292_v20 }
 0x359   :  { %696 = vadd.xlane.f32.xlu1 %v695_v62  ;;  %v674_v62 = vmul.f32 %v1609_v36, %v1553_v14 }
 0x35d   :  { %v810_v24 = vpop.xlane.xlu1 %809 }
 0x35e   :  { %v811_v25 = vsub.f32 %v1613_v46, %v810_v24  ;;  %v675_v24 = vpack.c.bf16 %v674_v62, %v674_v62 }
 0x360   :  { %v812_v27 = vmul.f32 1.442695, %v811_v25  ;;  %v754_v36 = vsel %vm706_vm5, %v675_v24, 0 }
 0x361   :  { %v467_v28 = vpop.permute.xlu1 %466 }
 0x362   :  { %1388 = vpow2.f32 %v812_v27  ;;  %v469_v29 = vmul.f32 %v467_v28, %v1555_v15  ;;  %v470_v30 = vmul.f32 %v467_v28, %v1551_v12  ;;  %v892_v28 = vmul.f32 %v1622_v48, %v1553_v14 }
 0x363   :  { %1390 = vpow2.f32 %v885_v26 }
 0x364   :  { %v471_v33 = vpack.c.bf16 %v470_v30, %v469_v29  ;;  %v893_v29 = vpack.c.bf16 %v892_v28, %v892_v28 }
 0x365   :  { %v550_v31 = vpop.permute.xlu1 %549 }
 0x366   :  { %v552_v34 = vmul.f32 %v550_v31, %v1555_v15  ;;  %v553_v42 = vmul.f32 %v550_v31, %v1551_v12  ;;  %v647_v12 = vsel %vm646_vm3, %v1586_v9, -inf }
 0x368   :  { %v554_v32 = vpack.c.bf16 %v553_v42, %v552_v34  ;;  %v1373_v34 = vld [vmem:[%s1789_s7] sm:$0xff]  }
 0x36a   :  { %474 = vrot.lane.b32.xlu1 %v471_v33, %s1453_s6  ;;  %v899_v33 = vsel %vm706_vm5, %v893_v29, 0 }
 0x36e   :  { %557 = vrot.lane.b32.xlu1 %v554_v32, %s1453_s6 }
 0x36f   :  { %v1668_v43 = vpop.eup %1388 }
 0x370   :  { %v814_v44 = vsel %vm646_vm3, %v1668_v43, 0.0  ;;  %v1672_v45 = vpop.eup %1390 }
 0x371   :  { %815 = vadd.xlane.f32.xlu0 %v814_v44  ;;  %v887_v46 = vsel %vm646_vm3, %v1672_v45, 0.0 }
 0x375   :  { %888 = vadd.xlane.f32.xlu0 %v887_v46 }
 0x38a   :  { %v329_v52 = vpop.xlane.xlu0 %328 }
 0x38b   :  { %392 = vrot.lane.b32.xlu0 %v307_v51, %s1453_s6  ;;  %1392 = vrcp.f32 %v329_v52 }
 0x38e   :  { %v458_v15 = vpop.xlane.xlu0 %457 }
 0x38f   :  { %1394 = vrcp.f32 %v458_v15 }
 0x392   :  { %270 = vmax.xlane.f32.xlu1 %v269_v54  ;;  %v541_v5 = vpop.xlane.xlu0 %540 }
 0x398   :  { %v1393_v53 = vpop.eup %1392 }
 0x399   :  { %v331_v55 = vmul.f32 %v1393_v53, %v1625_v40  ;;  %v700_v40 = vmul.f32 %v1605_v35, %v1553_v14  ;;  %v819_v35 = vmul.f32 %v1618_v39, %v1553_v14 }
 0x39b   :  { %v343_v57 = vpack.c.bf16 %v331_v55, %v331_v55  ;;  %v701_v1 = vpack.c.bf16 %v700_v40, %v700_v40  ;;  %v820_v4 = vpack.c.bf16 %v819_v35, %v819_v35 }
 0x39c   :  { %v1395_v41 = vpop.eup %1394 }
 0x39d   :  { %v460_v61 = vmul.f32 %v1395_v41, %v1629_v58  ;;  %v708_v2 = vsel %vm706_vm5, %v701_v1, 0  ;;  %v826_v7 = vsel %vm706_vm5, %v820_v4, 0 }
 0x39f   :  { %v472_v9 = vpack.c.bf16 %v460_v61, %v460_v61 }
 0x3a3   :  { %v346_v56 = vpop.permute.xlu1 %345 }
 0x3a4   :  { %1271 = vmatpush3.bf16.msra.mxu0 %v346_v56 }
 0x3a5   :  { %1276 = vmatprep.subr.bf16.mxu0 %v1451_v63 }
 0x3a7   :  { %1273 = vmatmul.mubr.msk.bf16.vlgmr.msra.gmra.mxu0 %vm268_vm2, %v343_v57 }
 0x3a8   :  { %1278 = vmatprep.mubr.msk.bf16.mxu0 %vm1452_vm4, %v1451_v63 }
 0x3aa   :  { %648 = vmax.xlane.f32.xlu0 %v647_v12 }
 0x3c5   :  { %v671_v8 = vpop.xlane.xlu0 %670 }
 0x3de   :  { %v294_v37 = vpop.xlane.xlu1 %293 }
 0x3e2   :  { %v697_v59 = vpop.xlane.xlu1 %696 }
 0x3e3   :  { %1396 = vrcp.f32 %v697_v59 }
 0x3e4   :  { %1398 = vrcp.f32 %v294_v37 }
 0x3e5   :  { %1400 = vrcp.f32 %v541_v5 }
 0x3e6   :  { %v475_v0 = vpop.permute.xlu1 %474 }
 0x3e7   :  { %1283 = vmatpush3.bf16.msra.mxu1 %v475_v0 }
 0x3e8   :  { %1294 = vmatprep.subr.bf16.mxu1 %v1451_v63 }
 0x3ea   :  { %1285 = vmatmul.mubr.msk.bf16.vlgmr.msra.gmra.mxu1 %vm268_vm2, %v472_v9 }
 0x3eb   :  { %1295 = vmatpush3.bf16.msra.mxu1 %v708_v2  ;;  %1296 = vmatprep.mubr.msk.bf16.mxu1 %vm1452_vm4, %v1451_v63 }
 0x3ec   :  { %1306 = vmatprep.subr.bf16.mxu1 %v1451_v63 }
 0x3f0   :  { %v1397_v58 = vpop.eup %1396 }
 0x3f1   :  { %v699_v3 = vmul.f32 %v1397_v58, %v1656_v21  ;;  %v1399_v11 = vpop.eup %1398  ;;  %v558_v21 = vpop.permute.xlu1 %557 }
 0x3f2   :  { %v296_v16 = vmul.f32 %v1399_v11, %v1652_v19  ;;  %v1401_v20 = vpop.eup %1400 }
 0x3f3   :  { %v702_v6 = vpack.c.bf16 %v699_v3, %v699_v3  ;;  %v543_v19 = vmul.f32 %v1401_v20, %v1633_v60 }
 0x3f4   :  { %v308_v18 = vpack.c.bf16 %v296_v16, %v296_v16 }
 0x3f5   :  { %1297 = vmatmul.mubr.msk.bf16.vlgmr.msra.gmra.mxu1 %vm646_vm3, %v702_v6  ;;  %v555_v26 = vpack.c.bf16 %v543_v19, %v543_v19 }
 0x3f6   :  { %1307 = vmatpush3.bf16.msra.mxu1 %v826_v7  ;;  %1308 = vmatprep.mubr.msk.bf16.mxu1 %vm1452_vm4, %v1451_v63 }
 0x3f7   :  { %1318 = vmatprep.subr.bf16.mxu1 %v1451_v63 }
 0x3fa   :  { %v816_v39 = vpop.xlane.xlu0 %815 }
 0x3fb   :  { %1402 = vrcp.f32 %v816_v39 }
 0x3fc   :  { %1404 = vrcp.f32 %v671_v8 }
 0x3fe   :  { %v889_v13 = vpop.xlane.xlu0 %888 }
 0x3ff   :  { %1406 = vrcp.f32 %v889_v13 }
 0x402   :  { %v393_v17 = vpop.permute.xlu0 %392 }
 0x403   :  { %1277 = vmatpush3.bf16.msra.mxu0 %v393_v17 }
 0x404   :  { %1288 = vmatprep.subr.bf16.mxu0 %v1451_v63 }
 0x406   :  { %1279 = vmatmul.mubr.msk.bf16.vlgmr.msra.gmra.mxu0 %vm268_vm2, %v308_v18 }
 0x407   :  { %1289 = vmatpush3.bf16.msra.mxu0 %v558_v21  ;;  %1290 = vmatprep.mubr.msk.bf16.mxu0 %vm1452_vm4, %v1451_v63 }
 0x408   :  { %v1403_v22 = vpop.eup %1402  ;;  %1300 = vmatprep.subr.bf16.mxu0 %v1451_v63 }
 0x409   :  { %v818_v23 = vmul.f32 %v1403_v22, %v1668_v43  ;;  %v1405_v27 = vpop.eup %1404 }
 0x40a   :  { %v673_v60 = vmul.f32 %v1405_v27, %v1646_v10  ;;  %v1372_v10 = vld [vmem:[%s1789_s7 + $0x8] sm:$0xff]  }
 0x40b   :  { %v821_v25 = vpack.c.bf16 %v818_v23, %v818_v23  ;;  %v1206_v23 = vld [vmem:[%s1790_s8] ss:$0 sm:$0xff] }
 0x40c   :  { %v676_v30 = vpack.c.bf16 %v673_v60, %v673_v60  ;;  %v1407_v31 = vpop.eup %1406 }
 0x40d   :  { %1309 = vmatmul.mubr.msk.bf16.vlgmr.msra.gmra.mxu1 %vm646_vm3, %v821_v25  ;;  %v891_v14 = vmul.f32 %v1407_v31, %v1672_v45 }
 0x40e   :  { %1291 = vmatmul.mubr.msk.bf16.vlgmr.msra.gmra.mxu0 %vm268_vm2, %v555_v26  ;;  %1322 = vmatprep.mubr.msk.bf16.mxu1 %vm1452_vm4, %v1451_v63 }
 0x40f   :  { %1301 = vmatpush3.bf16.msra.mxu0 %v754_v36  ;;  %1302 = vmatprep.mubr.msk.bf16.mxu0 %vm1452_vm4, %v1451_v63  ;;  %v894_v48 = vpack.c.bf16 %v891_v14, %v891_v14 }
 0x410   :  { %1312 = vmatprep.subr.bf16.mxu0 %v1451_v63  ;;  %1319 = vmatpush3.bf16.msra.mxu1 %v1372_v10 }
 0x411   :  { %1320 = vmatprep.subr.bf16.mxu1 %v1451_v63 }
 0x414   :  { %1321 = vmatpush3.bf16.msra.mxu1 %v1373_v34 }
 0x415   :  { %1334 = vmatprep.subr.bf16.mxu1 %v1451_v63 }
 0x416   :  { %1303 = vmatmul.mubr.msk.bf16.vlgmr.msra.gmra.mxu0 %vm646_vm3, %v676_v30 }
 0x417   :  { %1313 = vmatpush3.bf16.msra.mxu0 %v899_v33  ;;  %1314 = vmatprep.mubr.msk.bf16.mxu0 %vm1452_vm4, %v1451_v63 }
 0x418   :  { %1326 = vmatprep.subr.bf16.mxu0 %v1451_v63 }
 0x41b   :  { %v271_v41 = vpop.xlane.xlu1 %270 }
 0x41c   :  { %vm272_vm6 = vcmp.gt.f32.partialorder %v271_v41, 0.5  ;;  %v1375_v41 = vld [vmem:[%s1792_s10] sm:$0xff]  }
 0x41e   :  { %1315 = vmatmul.mubr.msk.bf16.vlgmr.msra.gmra.mxu0 %vm646_vm3, %v894_v48 }
 0x41f   :  { %1330 = vmatprep.mubr.msk.bf16.mxu0 %vm1452_vm4, %v1451_v63  ;;  %1327 = vmatpush3.bf16.msra.mxu0 %v1372_v10 }
 0x420   :  { %1328 = vmatprep.subr.bf16.mxu0 %v1451_v63 }
 0x423   :  { %1329 = vmatpush3.bf16.msra.mxu0 %v1373_v34 }
 0x433   :  { %v649_v13 = vpop.xlane.xlu0 %648 }
 0x434   :  { %vm650_vm7 = vcmp.gt.f32.partialorder %v649_v13, 0.5 }
 0x467   :  { %v385_v42 = vpop.f32.mrf.mxu0 }
 0x469   :  { %v1274_v32 = vpop.f32.mrf.mxu0 }
 0x46b   :  { %v388_v43 = vpop.f32.mrf.mxu0 }
 0x46d   :  { %v1275_v44 = vpop.f32.mrf.mxu0 }
 0x46e   :  { %v951_v44 = vld [vmem:[%s1791_s9] sm:$0x1] }
 0x4aa   :  { %v514_v45 = vpop.f32.mrf.mxu1 }
 0x4ac   :  { %v1286_v46 = vpop.f32.mrf.mxu1 }
 0x4ae   :  { %v517_v47 = vpop.f32.mrf.mxu1 }
 0x4b0   :  { %v1287_v49 = vpop.f32.mrf.mxu1 }
 0x4b5   :  { %v744_v50 = vpop.f32.mrf.mxu1 }
 0x4b7   :  { %v1298_v51 = vpop.f32.mrf.mxu1 }
 0x4b9   :  { %v747_v52 = vpop.f32.mrf.mxu1 }
 0x4bb   :  { %v1299_v53 = vpop.f32.mrf.mxu1 }
 0x4c6   :  { %v432_v54 = vpop.f32.mrf.mxu0 }
 0x4c7   :  { %v433_v56 = vadd.f32 %v432_v54, %v385_v42 }
 0x4c8   :  { %v1280_v55 = vpop.f32.mrf.mxu0 }
 0x4c9   :  { %v520_v37 = vadd.f32 %v514_v45, %v433_v56 }
 0x4ca   :  { %v435_v57 = vpop.f32.mrf.mxu0 }
 0x4cc   :  { %v1281_v12 = vpop.f32.mrf.mxu0 }
 0x4cd   :  { %v862_v15 = vpop.f32.mrf.mxu1 }
 0x4ce   :  { %v597_v59 = vpop.f32.mrf.mxu0 }
 0x4cf   :  { %v603_v40 = vadd.f32 %v597_v59, %v520_v37  ;;  %v1310_v61 = vpop.f32.mrf.mxu1  ;;  %v1374_v37 = vld [vmem:[%s1792_s10 + $0x8] sm:$0xff]  }
 0x4d0   :  { %v1292_v0 = vpop.f32.mrf.mxu0 }
 0x4d1   :  { %v604_v1 = vmax.f32 %v603_v40, 0.0  ;;  %v865_v9 = vpop.f32.mrf.mxu1 }
 0x4d2   :  { %v600_v2 = vpop.f32.mrf.mxu0 }
 0x4d3   :  { %v1744_v35 = vsel %vm272_vm6, %v604_v1, 0.0  ;;  %v1311_v58 = vpop.f32.mrf.mxu1 }
 0x4d4   :  { %v952_v3 = vpack.c.bf16 %v1744_v35, %v1744_v35  ;;  %v1293_v4 = vpop.f32.mrf.mxu0 }
 0x4d6   :  { %v790_v5 = vpop.f32.mrf.mxu0  ;;  %1323 = vmatmul.mubr.msk.bf16.vlgmr.msra.gmra.mxu1 %vm88_vm0, %v952_v3 }
 0x4d7   :  { %1338 = vmatprep.mubr.msk.bf16.mxu1 %vm1452_vm4, %v1451_v63  ;;  %v791_v7 = vadd.f32 %v790_v5, %v744_v50  ;;  %1335 = vmatpush3.bf16.msra.mxu1 %v1374_v37 }
 0x4d8   :  { %v1304_v6 = vpop.f32.mrf.mxu0  ;;  %1336 = vmatprep.subr.bf16.mxu1 %v1451_v63 }
 0x4d9   :  { %v868_v11 = vadd.f32 %v862_v15, %v791_v7 }
 0x4da   :  { %v793_v8 = vpop.f32.mrf.mxu0 }
 0x4db   :  { %1337 = vmatpush3.bf16.msra.mxu1 %v1375_v41 }
 0x4dc   :  { %v1305_v39 = vpop.f32.mrf.mxu0 }
 0x4de   :  { %v935_v16 = vpop.f32.mrf.mxu0 }
 0x4df   :  { %v941_v17 = vadd.f32 %v935_v16, %v868_v11 }
 0x4e0   :  { %v1316_v18 = vpop.f32.mrf.mxu0 }
 0x4e1   :  { %v942_v20 = vmax.f32 %v941_v17, 0.0  ;;  %v1211_v17 = vld [vmem:[%s1793_s11] ss:$0 sm:$0xff] }
 0x4e2   :  { %v938_v21 = vpop.f32.mrf.mxu0 }
 0x4e3   :  { %v1751_v62 = vsel %vm650_vm7, %v942_v20, 0.0 }
 0x4e4   :  { %v1029_v22 = vpack.c.bf16 %v1751_v62, %v1751_v62  ;;  %v1317_v19 = vpop.f32.mrf.mxu0 }
 0x4e6   :  { %1331 = vmatmul.mubr.msk.bf16.vlgmr.msra.gmra.mxu0 %vm88_vm0, %v1029_v22 }
 0x596   :  { %v1008_v24 = vpop.f32.mrf.mxu1 }
 0x597   :  { %v1009_v25 = vadd.f32 %v1206_v23, %v1008_v24 }
 0x598   :  { %v1324_v26 = vpop.f32.mrf.mxu1 }
 0x599   :  { %1408 = vtanh.f32 %v1009_v25 }
 0x59a   :  { %v1011_v27 = vpop.f32.mrf.mxu1 }
 0x59c   :  { %v1325_v36 = vpop.f32.mrf.mxu1 }
 0x5a6   :  { %v1409_v28 = vpop.eup %1408  ;;  %v1067_v60 = vpop.f32.mrf.mxu0 }
 0x5a7   :  { %v1068_v29 = vadd.f32 %v1206_v23, %v1067_v60  ;;  %v1015_v30 = vsel %vm88_vm0, %v1409_v28, 0.0 }
 0x5a8   :  { %v1332_v31 = vpop.f32.mrf.mxu0  ;;  %v1016_v33 = vrot.slane %v1015_v30, 4 }
 0x5a9   :  { %1410 = vtanh.f32 %v1068_v29 }
 0x5aa   :  { %v1070_v14 = vpop.f32.mrf.mxu0  ;;  %v1017_v48 = vadd.f32 %v1016_v33, %v1015_v30 }
 0x5ac   :  { %v1333_v10 = vpop.f32.mrf.mxu0  ;;  %v1018_v34 = vrot.slane %v1017_v48, 2 }
 0x5ae   :  { %v1019_v42 = vadd.f32 %v1018_v34, %v1017_v48 }
 0x5b0   :  { %v1020_v32 = vrot.slane %v1019_v42, 1 }
 0x5b2   :  { %v1021_v43 = vadd.f32 %v1020_v32, %v1019_v42 }
 0x5b4   :  { %v1023_v45 = vmul.f32 0.125, %v1021_v43 }
 0x5b6   :  { %v1411_v46 = vpop.eup %1410  ;;  %v1024_v47 = vmul.f32 %v1023_v45, %v951_v44 }
 0x5b7   :  { %v1074_v49 = vsel %vm88_vm0, %v1411_v46, 0.0 }
 0x5b8   :  { %v1026_v50 = vsel %vm1025_vm8, %v1024_v47, 0.0  ;;  %v1075_v51 = vrot.slane %v1074_v49, 4 }
 0x5b9   :  { %1027 = vadd.xlane.f32.xlu1 %v1026_v50 }
 0x5ba   :  { %v1076_v52 = vadd.f32 %v1075_v51, %v1074_v49 }
 0x5bc   :  { %v1077_v53 = vrot.slane %v1076_v52, 2 }
 0x5be   :  { %v1078_v54 = vadd.f32 %v1077_v53, %v1076_v52 }
 0x5c0   :  { %v1079_v55 = vrot.slane %v1078_v54, 1 }
 0x5c2   :  { %v1080_v56 = vadd.f32 %v1079_v55, %v1078_v54 }
 0x5c4   :  { %v1081_v57 = vmul.f32 0.125, %v1080_v56 }
 0x5c6   :  { %v1082_v12 = vmul.f32 %v1081_v57, %v951_v44 }
 0x5c8   :  { %v1083_v15 = vsel %vm1025_vm8, %v1082_v12, 0.0 }
 0x5c9   :  { %1084 = vadd.xlane.f32.xlu0 %v1083_v15 }
 0x642   :  { %v1028_v59 = vpop.xlane.xlu1 %1027 }
 0x652   :  { %v1085_v40 = vpop.xlane.xlu0 %1084 }
 0x653   :  { %v1086_v61 = vmax.f32 %v1028_v59, %v1085_v40 }
 0x655   :  { %v1087_v0 = vsub.f32 %v1028_v59, %v1086_v61  ;;  %v1090_v1 = vsub.f32 %v1085_v40, %v1086_v61 }
 0x657   :  { %v1088_v9 = vmul.f32 1.442695, %v1087_v0  ;;  %v1091_v2 = vmul.f32 1.442695, %v1090_v1 }
 0x659   :  { %1412 = vpow2.f32 %v1088_v9 }
 0x65a   :  { %1414 = vpow2.f32 %v1091_v2 }
 0x666   :  { %v1413_v58 = vpop.eup %1412 }
 0x667   :  { %v1415_v3 = vpop.eup %1414 }
 0x668   :  { %v1093_v4 = vadd.f32 %v1415_v3, %v1413_v58 }
 0x66a   :  { %1416 = vrcp.f32 %v1093_v4 }
 0x677   :  { %v1417_v5 = vpop.eup %1416 }
 0x678   :  { %v1096_v6 = vmul.f32 %v1417_v5, %v1413_v58  ;;  %v1102_v7 = vmul.f32 %v1417_v5, %v1415_v3 }
 0x67a   :  { %v1100_v8 = vrot.slane %v1096_v6, %v1566_v38  ;;  %v1106_v63 = vrot.slane %v1102_v7, %v1566_v38 }
 0x67c   :  { %v1101_v39 = vmul.f32 %v1100_v8, %v1744_v35  ;;  %v1107_v11 = vmul.f32 %v1106_v63, %v1751_v62 }
 0x67e   :  { %v1108_v13 = vadd.f32 %v1107_v11, %v1101_v39 }
 0x680   :  { %v1109_v16 = vpack.c.bf16 %v1108_v13, %v1108_v13 }
 0x682   :  { %1339 = vmatmul.mubr.msk.bf16.vlgmr.msra.gmra.mxu1 %vm88_vm0, %v1109_v16 }
 0x742   :  { %v1170_v18 = vpop.f32.mrf.mxu1 }
 0x743   :  { %v1171_v20 = vadd.f32 %v1211_v17, %v1170_v18 }
 0x744   :  { %v1340_v21 = vpop.f32.mrf.mxu1 }
 0x745   :  { %1177 = vst.msk [vmem:[%s1794_s12] sm:$0xff] %vm1176_vm9, %v1171_v20 }
 0x746   :  { %v1173_v38 = vpop.f32.mrf.mxu1 }
 0x748   :  { %v1341_v35 = vpop.f32.mrf.mxu1 }
 0x749   :  { %1182 = vsyncpa [#allocation3], 1 }

</bundles_post_ra>
